<compile_context>
chip_gen: v7x
topology: tpu7x:2x2x1
jax: 0.10.0
libtpu: 0.0.40
codegen_flags: <defaults>
</compile_context>

<pallas_src>
import jax
import jax.numpy as jnp
from jax.experimental import pallas as pl
from jax.experimental.pallas import tpu as pltpu


def _global_max_pool_kernel(x_ref, o_ref):
    # x_ref: (1, Tc, Ts) VMEM tile; o_ref: (1, 1, Ts), resident across the
    # channel grid axis (same output block index for every channel step).
    c = pl.program_id(2)
    partial = jnp.max(x_ref[...], axis=1, keepdims=True)  # XLU cross-sublane reduce

    @pl.when(c == 0)
    def _():
        # First channel tile initializes the accumulator (works for any dtype,
        # no -inf / iinfo special-casing needed).
        o_ref[...] = partial

    @pl.when(c > 0)
    def _():
        o_ref[...] = jnp.maximum(o_ref[...], partial)


def _pick_spatial_tile(S: int, max_tile: int = 2048) -> int:
    """Largest tile <= max_tile that is a multiple of 128 and divides S, else full S."""
    if S <= max_tile:
        return S
    if S % 128 == 0:
        t = (max_tile // 128) * 128
        while t >= 128:
            if S % t == 0:
                return t
            t -= 128
    return S  # full-extent block is always legal


def _pick_channel_tile(C: int, Ts: int, itemsize: int,
                       block_budget_bytes: int = 4 * 1024 * 1024) -> int:
    """Largest channel tile keeping one input block <= budget; multiple of 8 or full C."""
    max_tc = max(1, block_budget_bytes // max(1, Ts * itemsize))
    if C <= max_tc:
        return C
    t = (max_tc // 8) * 8
    while t >= 8:
        if C % t == 0:
            return t
        t -= 8
    return C  # no nice divisor found: fall back to the whole channel axis


def global_max_pool(x: jax.Array) -> jax.Array:
    """Equivalent of torch.max(x, dim=1)[0].unsqueeze(1) for NCHW input."""
    N, C, H, W = x.shape
    S = H * W
    itemsize = jnp.dtype(x.dtype).itemsize

    # Lane-dense layout: collapse spatial dims into the last axis.
    x2 = x.reshape(N, C, S)

    Ts = _pick_spatial_tile(S)
    Tc = _pick_channel_tile(C, Ts, itemsize)
    grid = (N, S // Ts, C // Tc)  # reduction (channel) axis last

    out = pl.pallas_call(
        _global_max_pool_kernel,
        out_shape=jax.ShapeDtypeStruct((N, 1, S), x.dtype),
        grid_spec=pltpu.PrefetchScalarGridSpec(
            num_scalar_prefetch=0,
            grid=grid,
            in_specs=[
                pl.BlockSpec((1, Tc, Ts), lambda n, s, c: (n, c, s)),
            ],
            # Output block index is independent of c -> stays resident in VMEM
            # as the running-max accumulator across channel tiles.
            out_specs=pl.BlockSpec((1, 1, Ts), lambda n, s, c: (n, 0, s)),
        ),
        compiler_params=pltpu.CompilerParams(
            dimension_semantics=("parallel", "parallel", "arbitrary"),
            vmem_limit_bytes=32 * 1024 * 1024,
        ),
    )(x2)

    return out.reshape(N, 1, H, W)


if __name__ == "__main__":
    key = jax.random.PRNGKey(0)
    # Small NCHW input consistent with the module's forward.
    x = jax.random.normal(key, (2, 4, 16, 16), dtype=jnp.float32)

    out = global_max_pool(x)
    out = jax.block_until_ready(out)

    # Reference: same semantics as torch.max(..., dim=1)[0].unsqueeze(1)
    ref = jnp.max(x, axis=1, keepdims=True)
    assert out.shape == (2, 1, 16, 16), out.shape
    assert out.dtype == x.dtype
    assert jnp.allclose(out, ref), "mismatch vs reference"

    print("KERNEL_OK")
</pallas_src>

<mosaic_0001>
module attributes {stable_mosaic.version = 11 : i64} {
  func.func @_global_max_pool_kernel(%arg0: i32, %arg1: i32, %arg2: i32, %arg3: memref<1x4x256xf32, #tpu.memory_space<vmem>>, %arg4: memref<1x1x256xf32, #tpu.memory_space<vmem>>) attributes {dimension_semantics = [#tpu.dimension_semantics<parallel>, #tpu.dimension_semantics<parallel>, #tpu.dimension_semantics<arbitrary>], iteration_bounds = array<i64: 2, 1, 1>, scalar_prefetch = 0 : i64, scratch_operands = 0 : i64, tpu.core_type = #tpu.core_type<tc>, window_params = [{transform_indices = @transform_0, window_bounds = array<i64: 1, 4, 256>}, {transform_indices = @transform_1, window_bounds = array<i64: 1, 1, 256>}]} {
    %c0 = arith.constant 0 : index
    %c0_0 = arith.constant 0 : index
    %c0_1 = arith.constant 0 : index
    %0 = vector.load %arg3[%c0, %c0_0, %c0_1] : memref<1x4x256xf32, #tpu.memory_space<vmem>>, vector<1x4x256xf32>
    %cst = arith.constant dense<0xFF800000> : vector<1x256xf32>
    %1 = vector.multi_reduction <maximumf>, %0, %cst [1] : vector<1x4x256xf32> to vector<1x256xf32>
    %2 = vector.shape_cast %1 : vector<1x256xf32> to vector<1x1x256xf32>
    %c0_i32 = arith.constant 0 : i32
    %3 = arith.cmpi eq, %arg2, %c0_i32 : i32
    %4 = arith.extui %3 : i1 to i32
    %c0_i32_2 = arith.constant 0 : i32
    %5 = arith.cmpi ne, %4, %c0_i32_2 : i32
    scf.if %5 {
      %c0_5 = arith.constant 0 : index
      %c0_6 = arith.constant 0 : index
      %c0_7 = arith.constant 0 : index
      %9 = vector.load %arg4[%c0_5, %c0_6, %c0_7] : memref<1x1x256xf32, #tpu.memory_space<vmem>>, vector<1x1x256xf32>
      tpu.vector_store %arg4[%c0_5, %c0_6, %c0_7], %2 {strides = array<i32>} : memref<1x1x256xf32, #tpu.memory_space<vmem>>, vector<1x1x256xf32>,
    } else {
    }
    %c0_i32_3 = arith.constant 0 : i32
    %6 = arith.cmpi sgt, %arg2, %c0_i32_3 : i32
    %7 = arith.extui %6 : i1 to i32
    %c0_i32_4 = arith.constant 0 : i32
    %8 = arith.cmpi ne, %7, %c0_i32_4 : i32
    scf.if %8 {
      %c0_5 = arith.constant 0 : index
      %c0_6 = arith.constant 0 : index
      %c0_7 = arith.constant 0 : index
      %9 = vector.load %arg4[%c0_5, %c0_6, %c0_7] : memref<1x1x256xf32, #tpu.memory_space<vmem>>, vector<1x1x256xf32>
      %10 = arith.maximumf %9, %2 : vector<1x1x256xf32>
      %c0_8 = arith.constant 0 : index
      %c0_9 = arith.constant 0 : index
      %c0_10 = arith.constant 0 : index
      %11 = vector.load %arg4[%c0_8, %c0_9, %c0_10] : memref<1x1x256xf32, #tpu.memory_space<vmem>>, vector<1x1x256xf32>
      tpu.vector_store %arg4[%c0_8, %c0_9, %c0_10], %10 {strides = array<i32>} : memref<1x1x256xf32, #tpu.memory_space<vmem>>, vector<1x1x256xf32>,
    } else {
    }
    return
  }
  func.func @transform_0(%arg0: i32, %arg1: i32, %arg2: i32) -> (i32, i32, i32) {
    %c0_i32 = arith.constant 0 : i32
    return %arg0, %arg2, %arg1 : i32, i32, i32
  }
  func.func @transform_1(%arg0: i32, %arg1: i32, %arg2: i32) -> (i32, i32, i32) {
    %c0_i32 = arith.constant 0 : i32
    %c0_i32_0 = arith.constant 0 : i32
    return %arg0, %c0_i32, %arg1 : i32, i32, i32
  }
}

</mosaic_0001>

<bundles_post_ra>
// kernel: tpu_custom_call.1
= control target key start
LH: loop header
LB: loop body
LE: loop exit
PB: predicated region body
PF: predicated region fallthrough
CT: control target
= control target key end

     0   :  { %6 = vsyncpa [#allocation3], 0  ;;  %s726_s0 = inlined_call_operand.hbm [shape: f32[2,4,256], index: 0, kind: input, shape index: {}]   ;;  %s727_s1 = inlined_call_operand.hbm [shape: f32[2,1,256], index: 1, kind: output, shape index: {}]  }
   0x1   :  { %8 = vsyncpa [#allocation3 + $0x1], 0 }
   0x2   :  { %9 = vsyncpa [#allocation4], 0 }
   0x3   :  { %11 = vsyncpa [#allocation4 + $0x1], 0  ;;  %s553_s6 = smov 0   ;;  %s555_s7 = smov 0  }
   0x4   :  { %s557_s8 = smov 0   ;;  %s559_s9 = smov 0  }
   0x5   :  { %s561_s10 = smov 0   ;;  %s563_s11 = smov 0  }
   0x6 LB: > { %s345_s12 = sadd.s32 4294967295, %s538_s11   ;;  %s346_s13 = sadd.s32 4294967294, %s538_s11   ;;  %s538_s11 = sphi %s563_s11, %s17_s11   ;;  %s534_s10 = sphi %s561_s10, %s743_s10   ;;  %s530_s9 = sphi %s559_s9, %s742_s9   ;;  %s526_s8 = sphi %s557_s8, %s741_s8   ;;  %s522_s7 = sphi %s555_s7, %s740_s7   ;;  %s518_s6 = sphi %s553_s6, %s739_s6  }
   0x7   : > { %s36_s14 = sadd.s32 1, %s534_s10  ;;  %s47_s15 = sadd.s32 1, %s526_s8 }
   0x8   : > { %p38_p0 = scmp.ge.s32.totalorder %s36_s14, 2  ;;  %p54_p1 = scmp.ne.s32.totalorder %s526_s8, %s522_s7 }
   0x9   : > { %p55_p2 = scmp.eq.s32.totalorder %s538_s11, 0  ;;  %p60_p3 = scmp.ne.s32.totalorder %s522_s7, %s518_s6 }
   0xa   : > { %s745_s14 = smov (%p38_p0, %s36_s14), 0  ;;  %p61_p5 = scmp.eq.s32.totalorder %s345_s12, 0 }
   0xb   : > { %p594_p4 = por %p55_p2, %p54_p1  ;;  %s40_s17 = ssub.s32 %s534_s10, %s745_s14 }
   0xc   : > { %p86_p6 = scmp.eq.s32.totalorder %s345_s12, 1  ;;  %p45_p7 = scmp.eq.s32.totalorder %s40_s17, 0 }
   0xd   : > { %p600_p8 = por %p61_p5, %p60_p3  ;;  %p92_p10 = scmp.eq.s32.totalorder %s346_s13, 1 }
   0xe   : > { %p604_p9 = por %p86_p6, %p54_p1  ;;  %p374_p13 = scmp.lt.s32.totalorder %s538_s11, 2 }
   0xf   : > { %s609_s20 = scalar_select %p45_p7, %s526_s8, %s47_s15  }
  0x10   : > { %s731_s19 = scalar_select %p604_p9, 1, 0 }
  0x11   : > { %p611_p11 = por %p92_p10, %p60_p3  ;;  %s112_s22 = sand.u32 1, %s526_s8  }
  0x12   : > { %s349_s23 = sshll.u32 %s112_s22, 3  ;;  %s360_s24 = sshll.u32 %s534_s10, 7 }
  0x13   : > { %s732_s21 = scalar_select %p611_p11, 1, 0 }
  0x14   : > { %s622_s27 = scalar_lea.hbm %s726_s0, %s360_s24  ;;  %s116_s28 = scalar_lea.vmem [#allocation2], %s349_s23 }
  0x15   : > { %s128_s29 = sshll.u32 %s116_s28, 4  ;;  %p628_p0 = pnand %p374_p13, %p594_p4  ;;  %s624_s29 = int_to_ptr.vmem [resolvable:$true] %s128_s29 }
  0x16   : > { %s113_s2 = scalar_lea.sflag [#allocation3], %s112_s22  ;;  %s426_s3 = scalar_lea.hbm %s622_s27, 128 }
  0x17   : > { %p427_p3 = scmp.ne.s32.totalorder %s622_s27, %s426_s3  ;;  %p428_p5 = pneg %p628_p0 }
  0x18   : > { %s431_s12 = scalar_lea.hbm %s726_s0, 256  ;;  %p432_p4 = scmp.lt.u32.totalorder %s622_s27, %s726_s0 }
  0x19   : > { %p429_p6 = pnand %p428_p5, %p427_p3  ;;  %p433_p10 = scmp.lt.u32.totalorder %s431_s12, %s426_s3 }
  0x1a   : > { %p435_p12 = scmp.lt.u32.totalorder %s426_s3, %s622_s27 }
  0x1b   : > { %p430_p7 = pneg %p429_p6  ;;  %p434_p13 = por %p433_p10, %p432_p4 }
  0x1d   : > { %p436_p1 = por %p435_p12, %p434_p13 }
  0x1f   : > { %p437_p2 = pnand %p436_p1, %p430_p7 }
  0x21   : > { %440 = shalt.err (!%p437_p2)
}
  0x22   : > { %s441_s16 = scalar_lea.vmem %s624_s29, 128  ;;  %s540_s17 = smov [#allocation2]  }
  0x23   : > { %p442_p3 = scmp.ne.s32.totalorder %s624_s29, %s441_s16  ;;  %s446_s22 = sshll.u32 %s540_s17, 4  ;;  %s447_s22 = int_to_ptr.vmem [resolvable:$false] %s446_s22 }
  0x24   : > { %s448_s23 = scalar_lea.vmem %s447_s22, 256  ;;  %p449_p9 = scmp.lt.s32.totalorder %s624_s29, %s447_s22 }
  0x25   : > { %p444_p6 = pnand %p442_p3, %p428_p5  ;;  %p450_p4 = scmp.lt.s32.totalorder %s448_s23, %s441_s16 }
  0x27   : > { %p445_p11 = pneg %p444_p6  ;;  %p451_p10 = por %p450_p4, %p449_p9 }
  0x29   : > { %p452_p12 = pnand %p451_p10, %p445_p11 }
  0x2b   : > { %455 = shalt.err (!%p452_p12)
}
  0x2c   : > { %369 = dma.hbm_to_vmem [thread:$0]  (!%p628_p0), %s622_s27, 128, %s624_s29, %s113_s2  }
  0x2d   : > { %p734_p1 = scmp.lt.s32.totalorder %s538_s11, 3  ;;  %p735_p2 = scmp.ge.s32.totalorder %s538_s11, 1 }
  0x2f   : > { %p134_p5 = pnand %p735_p2, %p734_p1 }
  0x30   : > { %s664_s24 = sand.u32 (!%p134_p5), 1, %s522_s7  }
  0x31   : > { %137 = sbr.rel (%p134_p5) target bundleno = 93 (0x5d), region = 24  ;;  %s353_s25 = sshll.u32 (!%p134_p5), %s664_s24, 3 }
  0x32   : > { %s140_s26 = scalar_lea.sflag (!%p134_p5), [#allocation3], %s664_s24  ;;  %s143_s28 = scalar_lea.vmem (!%p134_p5), [#allocation2], %s353_s25 }
  0x38   : > { %509 = dma.done.wait (%p600_p8), %s140_s26, 128  }
  0x39   : > { %511 = vsyncadd (%p600_p8), %s140_s26, 4294967168  ;;  %vm168_vm0 = vcmask 1043456   ;;  %v164_v0 = vld [vmem:[%s143_s28] sm:$0xff]  ;;  %v541_v9 = vmov 1966171168   ;;  %v193_v11 = vlaneseq  ;;  %s354_s18 = sshll.u32 %s664_s24, 1 }
  0x3a   : > { %v166_v1 = vcombine.high %v164_v0, %v164_v0  ;;  %v169_v2 = vsel %vm168_vm0, %v164_v0, -inf  ;;  %v191_v10 = vunpack.c.l.s4 %v541_v9  ;;  %s161_s27 = scalar_lea.vmem [#allocation5], %s354_s18  ;;  %s361_s30 = sshll.u32 %s530_s9, 5 }
  0x3b   : > { %v170_v3 = vrot.slane %v169_v2, 4  ;;  %v194_v17 = vshrl.u32 %v193_v11, 7  ;;  %s256_s29 = sshll.u32 %s161_s27, 4  ;;  %vm207_vm1 = vcmp.lt.s32.totalorder %v193_v11, 256  ;;  %s679_s4 = scalar_lea.hbm %s727_s1, %s361_s30  ;;  %s674_s29 = int_to_ptr.vmem [resolvable:$true] %s256_s29 }
  0x3c   : > { %v176_v4 = vsel %vm168_vm0, %v166_v1, -inf  ;;  %v192_v16 = vunpack.c.0.s8 %v191_v10  ;;  %s240_s5 = scalar_lea.sflag [#allocation4], %s664_s24  ;;  %s456_s12 = scalar_lea.vmem %s674_s29, 32 }
  0x3d   : > { %v171_v5 = vmax.f32 %v169_v2, %v170_v3  ;;  %v177_v6 = vrot.slane %v176_v4, 4  ;;  %p457_p8 = scmp.ne.s32.totalorder %s674_s29, %s456_s12  ;;  %p736_p9 = scmp.ne.s32.totalorder %s731_s19, 0 }
  0x3e   : > { %v195_v21 = vsub.s32 %v192_v16, %v194_v17  ;;  %s542_s9 = smov [#allocation5]  }
  0x3f   : > { %v172_v7 = vrot.slane %v171_v5, 2  ;;  %v178_v8 = vmax.f32 %v176_v4, %v177_v6  ;;  %p458_p11 = pnand %p457_p8, %p736_p9  ;;  %s460_s13 = sshll.u32 %s542_s9, 4  ;;  %s461_s13 = int_to_ptr.vmem [resolvable:$false] %s460_s13 }
  0x40   : > { %s462_s15 = scalar_lea.vmem %s461_s13, 64  ;;  %p463_p7 = scmp.lt.s32.totalorder %s674_s29, %s461_s13 }
  0x41   : > { %v173_v12 = vmax.f32 %v171_v5, %v172_v7  ;;  %v179_v13 = vrot.slane %v178_v8, 2  ;;  %p459_p0 = pneg %p458_p11  ;;  %p464_p13 = scmp.lt.s32.totalorder %s462_s15, %s456_s12 }
  0x43   : > { %v174_v14 = vrot.slane %v173_v12, 1  ;;  %v180_v15 = vmax.f32 %v178_v8, %v179_v13  ;;  %p465_p3 = por %p464_p13, %p463_p7 }
  0x45   : > { %v175_v18 = vmax.f32 %v173_v12, %v174_v14  ;;  %v181_v19 = vrot.slane %v180_v15, 1  ;;  %p466_p6 = pnand %p465_p3, %p459_p0 }
  0x47   : > { %v182_v20 = vmax.f32 %v180_v15, %v181_v19 }
  0x49   : > { %v189_v22 = vcombine.low %v175_v18, %v182_v20 }
  0x4b   : > { %v196_v23 = vrot.slane %v189_v22, %v195_v21 }
  0x4d   : > { %v203_v24 = vrot.slane %v196_v23, %v195_v21 }
  0x4f   : > { %209 = vst.msk [vmem:[%s161_s27] sm:$0x3] %vm207_vm1, %v203_v24 }
  0x50   : > { %469 = shalt.err (!%p466_p6)
}
  0x51   : > { %s470_s16 = scalar_lea.hbm %s679_s4, 32  ;;  %s474_s23 = scalar_lea.hbm %s727_s1, 64 }
  0x52   : > { %p471_p4 = scmp.ne.s32.totalorder %s679_s4, %s470_s16  ;;  %p475_p1 = scmp.lt.u32.totalorder %s679_s4, %s727_s1 }
  0x53   : > { %p476_p2 = scmp.lt.u32.totalorder %s474_s23, %s470_s16  ;;  %p478_p8 = scmp.lt.u32.totalorder %s470_s16, %s679_s4 }
  0x54   : > { %p472_p10 = pnand %p471_p4, %p736_p9 }
  0x55   : > { %p477_p5 = por %p476_p2, %p475_p1 }
  0x56   : > { %p473_p12 = pneg %p472_p10 }
  0x57   : > { %p479_p11 = por %p478_p8, %p477_p5 }
  0x59   : > { %p480_p0 = pnand %p479_p11, %p473_p12 }
  0x5b   : > { %483 = shalt.err (!%p480_p0)
}
  0x5c   : > { %364 = dma.vmem_to_hbm [thread:$0]  (%p736_p9), %s674_s29, 32, %s679_s4, %s240_s5  }
  0x5d PF: > { %s268_s26 = sand.u32 1, %s518_s6   ;;  %p737_p7 = scmp.ne.s32.totalorder %s732_s21, 0 }
  0x5e   : > { %p738_p13 = scmp.ge.s32.totalorder %s538_s11, 2  ;;  %s269_s28 = scalar_lea.sflag [#allocation4], %s268_s26 }
  0x60   : > { %p371_p3 = pnand %p738_p13, %p737_p7 }
  0x62   : > { %513 = dma.done.wait (!%p371_p3), %s269_s28, 32  }
  0x63   : > { %515 = vsyncadd (!%p371_p3), %s269_s28, 4294967264  ;;  %s17_s11 = sadd.s32 1, %s538_s11   ;;  %s739_s6 = smov %s522_s7 }
  0x64   : > { %p14_p6 = scmp.ge.s32.totalorder %s17_s11, 4   ;;  %s740_s7 = smov %s526_s8 }
  0x65   : > { %s741_s8 = smov %s609_s20  ;;  %s742_s9 = smov %s534_s10 }
  0x66   : > { %s743_s10 = smov %s745_s14  ;;  %16 = sbr.rel (!%p14_p6) target bundleno = 6 (0x6), region = 77 }
  0x6d   :  { %274 = vsyncpa [#allocation3], 1 }
  0x6e   :  { %276 = vsyncpa [#allocation3 + $0x1], 1 }
  0x6f   :  { %277 = vsyncpa [#allocation4], 1 }
  0x70   :  { %279 = vsyncpa [#allocation4 + $0x1], 1 }

</bundles_post_ra>
